<compile_context>
chip_gen: v6e
topology: v6e:2x2x1
jax: 0.10.0
libtpu: 0.0.40
codegen_flags: <defaults>
</compile_context>

<pallas_src>
import jax
import jax.numpy as jnp
from jax.experimental import pallas as pl
from jax.experimental.pallas import tpu as pltpu


# --------------------------------------------------------------------------
# Pallas kernel: fused (BN-scaled 1x1 conv) matmul + residual add + shift + ReLU
# --------------------------------------------------------------------------
def _project_kernel(x_ref, w_ref, rest_ref, b_ref, o_ref):
    # x_ref    : (1, C0, TP)   bf16  level-0 pixels, pixels in the lane dim
    # w_ref    : (Cout, C0)    bf16  BN-scale-folded 1x1 conv weight
    # rest_ref : (1, Cout, TP) f32   resized projections of the coarser levels
    # b_ref    : (Cout, 1)     f32   folded BN shift
    # o_ref    : (1, Cout, TP) f32
    y = jnp.dot(w_ref[...], x_ref[0], preferred_element_type=jnp.float32)
    y = y + rest_ref[0] + b_ref[...]
    o_ref[0] = jnp.maximum(y, 0.0).astype(o_ref.dtype)


def _round_up(x, m):
    return (x + m - 1) // m * m


def _choose_tile_p(hw, cin, cout, *, max_tile=8192, vmem_budget_bytes=24 << 20):
    """Largest 128-multiple pixel tile that keeps double-buffered VMEM modest
    (budget chosen to also fit v7x's 64 MiB physical / 32 MiB scoped VMEM)."""
    # Per pixel column: x (bf16) + rest (f32) + out (f32), each double-buffered.
    per_pixel = 2 * (cin * 2 + cout * 4 + cout * 4)
    cap = max(128, (vmem_budget_bytes // per_pixel) // 128 * 128)
    return int(min(max_tile, _round_up(hw, 128), cap))


def fused_project_1x1(x0, w0, rest, shift, *, max_tile=8192):
    """x0: (N, C0, P) bf16; w0: (Cout, C0) bf16; rest: (N, Cout, P) f32;
    shift: (Cout, 1) f32.  Returns (N, Cout, P) f32."""
    N, C0, P = x0.shape
    Cout = w0.shape[0]
    tile_p = _choose_tile_p(P, C0, Cout, max_tile=max_tile)
    p_pad = pl.cdiv(P, tile_p) * tile_p
    if p_pad != P:
        pad = ((0, 0), (0, 0), (0, p_pad - P))
        x0 = jnp.pad(x0, pad)
        rest = jnp.pad(rest, pad)

    grid = (N, p_pad // tile_p)
    out = pl.pallas_call(
        _project_kernel,
        out_shape=jax.ShapeDtypeStruct((N, Cout, p_pad), jnp.float32),
        grid_spec=pltpu.PrefetchScalarGridSpec(
            num_scalar_prefetch=0,
            grid=grid,
            in_specs=[
                pl.BlockSpec((1, C0, tile_p), lambda n, i: (n, 0, i)),
                pl.BlockSpec((Cout, C0), lambda n, i: (0, 0)),
                pl.BlockSpec((1, Cout, tile_p), lambda n, i: (n, 0, i)),
                pl.BlockSpec((Cout, 1), lambda n, i: (0, 0)),
            ],
            out_specs=pl.BlockSpec((1, Cout, tile_p), lambda n, i: (n, 0, i)),
        ),
        compiler_params=pltpu.CompilerParams(
            dimension_semantics=("parallel", "parallel")),
    )(x0, w0, rest, shift)
    return out[:, :, :P] if p_pad != P else out


# --------------------------------------------------------------------------
# Bilinear resize (align_corners=True) helpers
# --------------------------------------------------------------------------
def _interp_positions(src, dst):
    if dst == 1:
        pos = jnp.zeros((1,), jnp.float32)
    else:
        pos = jnp.arange(dst, dtype=jnp.float32) * ((src - 1) / (dst - 1))
    lo = jnp.clip(jnp.floor(pos).astype(jnp.int32), 0, src - 1)
    hi = jnp.minimum(lo + 1, src - 1)
    frac = pos - lo.astype(jnp.float32)
    return lo, hi, frac


def _interp_matrix(src, dst):
    """(dst, src) bilinear align_corners=True interpolation matrix (MXU-friendly)."""
    lo, hi, frac = _interp_positions(src, dst)
    return (jax.nn.one_hot(lo, src, dtype=jnp.float32) * (1.0 - frac)[:, None]
            + jax.nn.one_hot(hi, src, dtype=jnp.float32) * frac[:, None])


# --------------------------------------------------------------------------
# ResolutionAlign forward (inference)
# --------------------------------------------------------------------------
def resolution_align_forward(features, params):
    """features: list of NCHW arrays.  Returns (N, Cout, H0, W0) f32 (eval mode)."""
    x0 = features[0]
    N, C0, H, W = x0.shape
    P = H * W

    w = params["conv_w"].astype(jnp.float32)            # (Cout, Cin_total)
    gamma, beta = params["bn_gamma"], params["bn_beta"]
    mean, var, eps = params["bn_mean"], params["bn_var"], params["bn_eps"]
    scale = gamma / jnp.sqrt(var + eps)                  # (Cout,)
    shift = beta - mean * scale                          # (Cout,)
    w_scaled = w * scale[:, None]                        # fold BN scale into conv

    Cout = w.shape[0]
    ch_sizes = [f.shape[1] for f in features]
    assert sum(ch_sizes) == w.shape[1], "conv weight / feature channel mismatch"
    offs = [0]
    for c in ch_sizes:
        offs.append(offs[-1] + c)

    # Coarse levels: the 1x1 conv commutes with the (linear) bilinear resize,
    # so project at native resolution first, then resize with small
    # interpolation matmuls and sum.  Avoids the concat and raw-feature resize.
    rest = jnp.zeros((N, Cout, H, W), jnp.float32)
    for lvl in range(1, len(features)):
        feat = features[lvl].astype(jnp.float32)
        w_l = w_scaled[:, offs[lvl]:offs[lvl + 1]]       # (Cout, C_l)
        y_l = jnp.einsum('oc,nchw->nohw', w_l, feat)     # project at native res
        h_l, w_l_sp = feat.shape[2], feat.shape[3]
        if (h_l, w_l_sp) != (H, W):
            rh = _interp_matrix(h_l, H)                  # (H, h_l)
            rw = _interp_matrix(w_l_sp, W)               # (W, w_l_sp)
            y_l = jnp.einsum('is,nost->noit', rh, y_l)
            y_l = jnp.einsum('jt,noit->noij', rw, y_l)
        rest = rest + y_l

    # Hot path: level-0 projection fused with the level sum, BN shift and ReLU.
    out_flat = fused_project_1x1(
        x0.reshape(N, C0, P).astype(jnp.bfloat16),
        w_scaled[:, :C0].astype(jnp.bfloat16),
        rest.reshape(N, Cout, P),
        shift.reshape(Cout, 1).astype(jnp.float32),
    )
    # TODO(synk): nn.Dropout2d(p=0.1) is identity in eval mode; training-mode
    # channel dropout (and train-mode BatchNorm batch stats) are not implemented.
    return out_flat.reshape(N, Cout, H, W)


# --------------------------------------------------------------------------
# Pure-JAX reference (original op ordering: resize -> concat -> conv/BN/ReLU)
# --------------------------------------------------------------------------
def _resize_bilinear_ref(x, dst_h, dst_w):
    _, _, H, W = x.shape
    h0, h1, fh = _interp_positions(H, dst_h)
    w0, w1, fw = _interp_positions(W, dst_w)
    top, bot = x[:, :, h0, :], x[:, :, h1, :]
    rows = top + (bot - top) * fh[None, None, :, None]
    left, right = rows[:, :, :, w0], rows[:, :, :, w1]
    return left + (right - left) * fw[None, None, None, :]


def _reference_forward(features, params):
    dst_h, dst_w = features[0].shape[2], features[0].shape[3]
    resized = [features[0]]
    for f in features[1:]:
        if (f.shape[2], f.shape[3]) == (dst_h, dst_w):
            resized.append(f)
        else:
            resized.append(_resize_bilinear_ref(f, dst_h, dst_w))
    cat = jnp.concatenate(resized, axis=1)
    w = params["conv_w"]
    scale = params["bn_gamma"] / jnp.sqrt(params["bn_var"] + params["bn_eps"])
    shift = params["bn_beta"] - params["bn_mean"] * scale
    y = jnp.einsum('oc,nchw->nohw', w, cat)
    y = y * scale[None, :, None, None] + shift[None, :, None, None]
    return jnp.maximum(y, 0.0)


# --------------------------------------------------------------------------
# Deterministic parameter init + example run
# --------------------------------------------------------------------------
def make_params(in_channels, out_channels, key):
    k_w, k_g, k_b = jax.random.split(key, 3)
    return {
        "conv_w": 0.1 * jax.random.normal(k_w, (out_channels, in_channels), jnp.float32),
        "bn_gamma": 1.0 + 0.05 * jax.random.normal(k_g, (out_channels,), jnp.float32),
        "bn_beta": 0.05 * jax.random.normal(k_b, (out_channels,), jnp.float32),
        "bn_mean": jnp.zeros((out_channels,), jnp.float32),
        "bn_var": jnp.ones((out_channels,), jnp.float32),
        "bn_eps": 1e-5,
    }


if __name__ == "__main__":
    key = jax.random.PRNGKey(0)
    k0, k1, k2, kp = jax.random.split(key, 4)

    # Small multi-scale feature pyramid (NCHW), typical of FarSeg++ inputs.
    N, C, H, W = 2, 4, 16, 16
    feats = [
        jax.random.normal(k0, (N, C, H, W), jnp.float32),
        jax.random.normal(k1, (N, C, H // 2, W // 2), jnp.float32),
        jax.random.normal(k2, (N, C, H // 4, W // 4), jnp.float32),
    ]
    in_channels = C * len(feats)   # 12 after (virtual) concat
    out_channels = 8

    params = make_params(in_channels, out_channels, kp)
    out = resolution_align_forward(feats, params)
    jax.block_until_ready(out)

    assert out.shape == (N, out_channels, H, W)
    ref = _reference_forward(feats, params)
    err = float(jnp.max(jnp.abs(out - ref)))
    assert err < 5e-2, f"mismatch vs pure-JAX reference: max abs err = {err}"
    print("KERNEL_OK")
</pallas_src>

<mosaic_0001>
module attributes {stable_mosaic.version = 11 : i64} {
  func.func @_project_kernel(%arg0: i32, %arg1: i32, %arg2: memref<1x4x256xbf16, #tpu.memory_space<vmem>>, %arg3: memref<8x4xbf16, #tpu.memory_space<vmem>>, %arg4: memref<1x8x256xf32, #tpu.memory_space<vmem>>, %arg5: memref<8x1xf32, #tpu.memory_space<vmem>>, %arg6: memref<1x8x256xf32, #tpu.memory_space<vmem>>) attributes {dimension_semantics = [#tpu.dimension_semantics<parallel>, #tpu.dimension_semantics<parallel>], iteration_bounds = array<i64: 2, 1>, scalar_prefetch = 0 : i64, scratch_operands = 0 : i64, tpu.core_type = #tpu.core_type<tc>, window_params = [{transform_indices = @transform_0, window_bounds = array<i64: 1, 4, 256>}, {pipeline_mode = #tpu.pipeline_mode<synchronous>, transform_indices = @transform_1, window_bounds = array<i64: 8, 4>}, {transform_indices = @transform_2, window_bounds = array<i64: 1, 8, 256>}, {pipeline_mode = #tpu.pipeline_mode<synchronous>, transform_indices = @transform_3, window_bounds = array<i64: 8, 1>}, {transform_indices = @transform_4, window_bounds = array<i64: 1, 8, 256>}]} {
    %c0 = arith.constant 0 : index
    %c0_0 = arith.constant 0 : index
    %0 = vector.load %arg3[%c0, %c0_0] : memref<8x4xbf16, #tpu.memory_space<vmem>>, vector<8x4xbf16>
    %c0_1 = arith.constant 0 : index
    %c0_2 = arith.constant 0 : index
    %c0_3 = arith.constant 0 : index
    %1 = vector.load %arg2[%c0_1, %c0_2, %c0_3] : memref<1x4x256xbf16, #tpu.memory_space<vmem>>, vector<1x4x256xbf16>
    %2 = vector.shape_cast %1 : vector<1x4x256xbf16> to vector<4x256xbf16>
    %cst = arith.constant dense<0.000000e+00> : vector<8x256xf32>
    %3 = tpu.matmul %0, %2, %cst {dimension_numbers = #tpu.dot_dimension_numbers<[1], [0], [0], [1], [0, 0, 1, 1], [], []>} : vector<8x4xbf16>, vector<4x256xbf16>, vector<8x256xf32> -> vector<8x256xf32>
    %c0_4 = arith.constant 0 : index
    %c0_5 = arith.constant 0 : index
    %c0_6 = arith.constant 0 : index
    %4 = vector.load %arg4[%c0_4, %c0_5, %c0_6] : memref<1x8x256xf32, #tpu.memory_space<vmem>>, vector<1x8x256xf32>
    %5 = vector.shape_cast %4 : vector<1x8x256xf32> to vector<8x256xf32>
    %6 = arith.addf %3, %5 : vector<8x256xf32>
    %c0_7 = arith.constant 0 : index
    %c0_8 = arith.constant 0 : index
    %7 = vector.load %arg5[%c0_7, %c0_8] : memref<8x1xf32, #tpu.memory_space<vmem>>, vector<8x1xf32>
    %8 = vector.broadcast %7 : vector<8x1xf32> to vector<8x256xf32>
    %9 = arith.addf %6, %8 : vector<8x256xf32>
    %cst_9 = arith.constant 0.000000e+00 : f32
    %10 = vector.broadcast %cst_9 : f32 to vector<8x256xf32>
    %11 = arith.maximumf %9, %10 : vector<8x256xf32>
    %c0_10 = arith.constant 0 : index
    %c0_11 = arith.constant 0 : index
    %c0_12 = arith.constant 0 : index
    %12 = vector.load %arg6[%c0_10, %c0_11, %c0_12] : memref<1x8x256xf32, #tpu.memory_space<vmem>>, vector<1x8x256xf32>
    %13 = vector.shape_cast %12 : vector<1x8x256xf32> to vector<8x256xf32>
    %14 = vector.shape_cast %11 : vector<8x256xf32> to vector<1x8x256xf32>
    tpu.vector_store %arg6[%c0_10, %c0_11, %c0_12], %14 {strides = array<i32>} : memref<1x8x256xf32, #tpu.memory_space<vmem>>, vector<1x8x256xf32>,
    return
  }
  func.func @transform_0(%arg0: i32, %arg1: i32) -> (i32, i32, i32) {
    %c0_i32 = arith.constant 0 : i32
    %c0_i32_0 = arith.constant 0 : i32
    return %arg0, %c0_i32, %arg1 : i32, i32, i32
  }
  func.func @transform_1(%arg0: i32, %arg1: i32) -> (i32, i32) {
    %c0_i32 = arith.constant 0 : i32
    %c0_i32_0 = arith.constant 0 : i32
    %c0_i32_1 = arith.constant 0 : i32
    return %c0_i32, %c0_i32_0 : i32, i32
  }
  func.func @transform_2(%arg0: i32, %arg1: i32) -> (i32, i32, i32) {
    %c0_i32 = arith.constant 0 : i32
    %c0_i32_0 = arith.constant 0 : i32
    return %arg0, %c0_i32, %arg1 : i32, i32, i32
  }
  func.func @transform_3(%arg0: i32, %arg1: i32) -> (i32, i32) {
    %c0_i32 = arith.constant 0 : i32
    %c0_i32_0 = arith.constant 0 : i32
    %c0_i32_1 = arith.constant 0 : i32
    return %c0_i32, %c0_i32_0 : i32, i32
  }
  func.func @transform_4(%arg0: i32, %arg1: i32) -> (i32, i32, i32) {
    %c0_i32 = arith.constant 0 : i32
    %c0_i32_0 = arith.constant 0 : i32
    return %arg0, %c0_i32, %arg1 : i32, i32, i32
  }
}

</mosaic_0001>

<bundles_post_ra>
// kernel: tpu_custom_call.1
= control target key start
LH: loop header
LB: loop body
LE: loop exit
PB: predicated region body
PF: predicated region fallthrough
CT: control target
= control target key end

     0   :  { %9 = vsyncpa [#allocation3], 0  ;;  %s841_s0 = inlined_call_operand.vmem [shape: bf16[2,4,256], index: 0, kind: input, shape index: {}]   ;;  %s842_s1 = inlined_call_operand.vmem [shape: bf16[8,4], index: 1, kind: input, shape index: {}]   ;;  %s843_s2 = inlined_call_operand.hbm [shape: f32[2,8,256], index: 2, kind: input, shape index: {}]   ;;  %s844_s3 = inlined_call_operand.vmem [shape: f32[8,1], index: 3, kind: input, shape index: {}]   ;;  %s845_s4 = inlined_call_operand.hbm [shape: f32[2,8,256], index: 4, kind: output, shape index: {}]  }
   0x1   :  { %11 = vsyncpa [#allocation3 + $0x1], 0 }
   0x2   :  { %12 = vsyncpa [#allocation4], 0 }
   0x3   :  { %14 = vsyncpa [#allocation4 + $0x1], 0  ;;  %s692_s15 = smov 0   ;;  %s694_s16 = smov 0  }
   0x4   :  { %s696_s17 = smov 0   ;;  %s698_s18 = smov 0  }
   0x5   :  { %s700_s19 = smov 0   ;;  %s702_s20 = smov 0  }
   0x6 LB: > { %s467_s21 = sadd.s32 4294967295, %s662_s20   ;;  %s468_s22 = sadd.s32 4294967294, %s662_s20   ;;  %s662_s20 = sphi %s702_s20, %s20_s20   ;;  %s658_s19 = sphi %s700_s19, %s857_s19   ;;  %s654_s18 = sphi %s698_s18, %s856_s18   ;;  %s650_s17 = sphi %s696_s17, %s855_s17   ;;  %s646_s16 = sphi %s694_s16, %s854_s16   ;;  %s642_s15 = sphi %s692_s15, %s853_s15  }
   0x7   : > { %s32_s23 = sadd.s32 1, %s658_s19  ;;  %s90_s24 = sadd.s32 1, %s650_s17 }
   0x8   : > { %p34_p0 = scmp.ge.s32.totalorder %s32_s23, 2  ;;  %p97_p1 = scmp.ne.s32.totalorder %s650_s17, %s646_s16 }
   0x9   : > { %p98_p2 = scmp.eq.s32.totalorder %s662_s20, 0  ;;  %p103_p3 = scmp.ne.s32.totalorder %s646_s16, %s642_s15 }
   0xa   : > { %s859_s23 = smov (%p34_p0, %s32_s23), 0  ;;  %p104_p5 = scmp.eq.s32.totalorder %s467_s21, 0 }
   0xb   : > { %p733_p4 = por %p98_p2, %p97_p1  ;;  %s85_s26 = ssub.s32 %s658_s19, %s859_s23 }
   0xc   : > { %p150_p6 = scmp.eq.s32.totalorder %s467_s21, 1  ;;  %p88_p7 = scmp.eq.s32.totalorder %s85_s26, 0 }
   0xd   : > { %p739_p8 = por %p104_p5, %p103_p3  ;;  %p156_p10 = scmp.eq.s32.totalorder %s468_s22, 1 }
   0xe   : > { %p743_p9 = por %p150_p6, %p97_p1  ;;  %p502_p13 = scmp.lt.s32.totalorder %s662_s20, 2 }
   0xf   : > { %s748_s29 = scalar_select %p88_p7, %s650_s17, %s90_s24  }
  0x10   : > { %p750_p11 = por %p156_p10, %p103_p3  ;;  %s195_s5 = sand.u32 1, %s650_s17  }
  0x11   : > { %s471_s6 = sshll.u32 %s195_s5, 4  ;;  %s487_s7 = sshll.u32 %s658_s19, 8 }
  0x12   : > { %s849_s30 = scalar_select %p750_p11, 1, 0 }
  0x13   : > { %s207_s10 = scalar_lea.hbm %s843_s2, %s487_s7  ;;  %s199_s11 = scalar_lea.vmem [#allocation2], %s471_s6 }
  0x14   : > { %s209_s12 = sshll.u32 %s199_s11, 4  ;;  %p763_p0 = pnand %p502_p13, %p733_p4  ;;  %s210_s12 = int_to_ptr.vmem [resolvable:$true] %s209_s12 }
  0x15   : > { %p474_p1 = scmp.ge.s32.totalorder %s662_s20, 1  ;;  %p214_p2 = scmp.lt.s32.totalorder %s662_s20, 3 }
  0x16   : > { %s196_s14 = scalar_lea.sflag [#allocation3], %s195_s5  ;;  %p556_p3 = pneg %p763_p0 }
  0x17   : > { %s567_s21 = scalar_lea.vmem %s210_s12, 256  ;;  %s664_s22 = smov [#allocation2]  }
  0x18   : > { %p568_p5 = scmp.ne.s32.totalorder %s210_s12, %s567_s21  ;;  %s572_s24 = sshll.u32 %s664_s22, 4  ;;  %s573_s24 = int_to_ptr.vmem [resolvable:$false] %s572_s24 }
  0x19   : > { %s574_s26 = scalar_lea.vmem %s573_s24, 512  ;;  %p575_p10 = scmp.lt.s32.totalorder %s210_s12, %s573_s24 }
  0x1a   : > { %p570_p6 = pnand %p568_p5, %p556_p3  ;;  %p576_p12 = scmp.lt.s32.totalorder %s574_s26, %s567_s21 }
  0x1c   : > { %p571_p7 = pneg %p570_p6  ;;  %p577_p4 = por %p576_p12, %p575_p10 }
  0x1e   : > { %p578_p13 = pnand %p577_p4, %p571_p7 }
  0x20   : > { %581 = shalt.err (!%p578_p13)
}
  0x21   : > { %497 = dma.hbm_to_vmem [thread:$0]  (!%p763_p0), %s207_s10, 256, %s210_s12, %s196_s14  }
  0x22   : > { %p215_p11 = pnand %p474_p1, %p214_p2 }
  0x23   : > { %s778_s25 = sand.u32 (!%p215_p11), 1, %s646_s16  }
  0x24   : > { %218 = sbr.rel (%p215_p11) target bundleno = 269 (0x10d), region = 36  ;;  %s475_s5 = sshll.u32 (!%p215_p11), %s778_s25, 4 }
  0x25   : > { %s221_s6 = scalar_lea.sflag (!%p215_p11), [#allocation3], %s778_s25  ;;  %s224_s7 = scalar_lea.vmem (!%p215_p11), [#allocation2], %s475_s5 }
  0x29   : > { %633 = dma.done.wait (%p739_p8), %s221_s6, 256  }
  0x2a   : > { %635 = vsyncadd (%p739_p8), %s221_s6, 4294967040  ;;  %p259_p12 = scmp.lt.s32.totalorder %s654_s18, 1  ;;  %v665_v0 = vmov 0   ;;  %vm288_vm0 = vcmask 1041408   ;;  %v336_v4 = vld [vmem:[%s844_s3] sm:$0xff]  ;;  %vm284_vm1 = vcmask 31744  }
  0x2b   : > { %327 = vmatprep.mubr.bf16.mxu0 %v665_v0  ;;  %553 = vset.pattern.permute.xlu0 %v665_v0  ;;  %v271_v5 = vld [vmem:[%s842_s1] sm:$0xf]  ;;  %v274_v9 = vld [vmem:[%s224_s7 + $0x8] sm:$0xff]  ;;  %s489_s22 = sshll.u32 %s654_s18, 8  ;;  %s257_s24 = scalar_lea.vmem [#allocation5], %s475_s5 }
  0x2c   : > { %s260_s8 = scalar_select %p259_p12, %s654_s18, 1  ;;  %339 = vperm.xlu0 %553, %v336_v4   ;;  %v273_v6 = vld [vmem:[%s224_s7] sm:$0xff] }
  0x2d   : > { %s365_s26 = sshll.u32 %s257_s24, 4  ;;  %s363_s7 = scalar_lea.hbm %s845_s4, %s489_s22  ;;  %s366_s26 = int_to_ptr.vmem [resolvable:$true] %s365_s26 }
  0x2e   : > { %s488_s9 = sshll.u32 %s260_s8, 2  ;;  %s582_s10 = scalar_lea.vmem %s366_s26, 256 }
  0x2f   : > { %s266_s12 = scalar_lea.vmem %s841_s0, %s488_s9  ;;  %s349_s9 = scalar_lea.sflag [#allocation4], %s778_s25 }
  0x30   : > { %v479_v1 = vld.sshfl [vmem:[%s266_s12] sm:$0x33 pattern:$0x76325410]  ;;  %p583_p8 = scmp.ne.s32.totalorder %s366_s26, %s582_s10  ;;  %s666_s18 = smov [#allocation5]  }
  0x31   : > { %v283_v2 = vcombine.high %v479_v1, %v479_v1  ;;  %v290_v3 = vsel %vm288_vm0, %v479_v1, 0  ;;  %s586_s5 = sshll.u32 %s666_s18, 4  ;;  %s587_s5 = int_to_ptr.vmem [resolvable:$false] %s586_s5 }
  0x32   : > { %p584_p11 = pnand %p583_p8, %p743_p9  ;;  %s588_s11 = scalar_lea.vmem %s587_s5, 512 }
  0x33   : > { %480 = vmatprep.subr.msk.bf16.mxu0 %vm288_vm0, %v283_v2  ;;  %p589_p1 = scmp.lt.s32.totalorder %s366_s26, %s587_s5  ;;  %p590_p2 = scmp.lt.s32.totalorder %s588_s11, %s582_s10 }
  0x34   : > { %310 = vmatpush1.bf16.msra.mxu0 %v290_v3  ;;  %p585_p0 = pneg %p584_p11 }
  0x35   : > { %p591_p3 = por %p590_p2, %p589_p1 }
  0x37   : > { %481 = vmatmul.mubr.msk.bf16.vlgmr.msra.gmra.mxu0 %vm284_vm1, %v271_v5  ;;  %p592_p5 = pnand %p591_p3, %p585_p0 }
  0xa7   : > { %v340_v8 = vpop.permute.xlu0 %339 }
  0xf7   : > { %v329_v7 = vpop.f32.mrf.mxu0 }
  0xf8   : > { %v330_v10 = vadd.f32 %v329_v7, %v273_v6 }
  0xf9   : > { %v331_v11 = vpop.f32.mrf.mxu0 }
  0xfa   : > { %v342_v12 = vadd.f32 %v340_v8, %v330_v10  ;;  %v332_v13 = vadd.f32 %v331_v11, %v274_v9 }
  0xfb   : > { %v333_v14 = vpop.f32.mrf.mxu0 }
  0xfc   : > { %v344_v15 = vmax.f32 %v342_v12, 0.0  ;;  %v343_v16 = vadd.f32 %v340_v8, %v332_v13 }
  0xfd   : > { %v334_v17 = vpop.f32.mrf.mxu0 }
  0xfe   : > { %346 = vst [vmem:[%s257_s24] sm:$0xff] %v344_v15  ;;  %v345_v18 = vmax.f32 %v343_v16, 0.0 }
 0x100   : > { %347 = vst [vmem:[%s257_s24 + $0x8] sm:$0xff] %v345_v18 }
 0x101   : > { %595 = shalt.err (!%p592_p5)
}
 0x102   : > { %s596_s12 = scalar_lea.hbm %s363_s7, 256  ;;  %s600_s14 = scalar_lea.hbm %s845_s4, 512 }
 0x103   : > { %p597_p6 = scmp.ne.s32.totalorder %s363_s7, %s596_s12  ;;  %p601_p4 = scmp.lt.s32.totalorder %s363_s7, %s845_s4 }
 0x104   : > { %p602_p13 = scmp.lt.s32.totalorder %s600_s14, %s596_s12 }
 0x105   : > { %p598_p7 = pnand %p597_p6, %p743_p9 }
 0x106   : > { %p603_p12 = por %p602_p13, %p601_p4 }
 0x107   : > { %p599_p10 = pneg %p598_p7 }
 0x109   : > { %p604_p8 = pnand %p603_p12, %p599_p10 }
 0x10b   : > { %607 = shalt.err (!%p604_p8)
}
 0x10c   : > { %492 = dma.vmem_to_hbm [thread:$0]  (%p743_p9), %s366_s26, 256, %s363_s7, %s349_s9  }
 0x10d PF: > { %s377_s22 = sand.u32 1, %s642_s15   ;;  %p851_p11 = scmp.ne.s32.totalorder %s849_s30, 0 }
 0x10e   : > { %p852_p0 = scmp.ge.s32.totalorder %s662_s20, 2  ;;  %s378_s24 = scalar_lea.sflag [#allocation4], %s377_s22 }
 0x110   : > { %p499_p1 = pnand %p852_p0, %p851_p11 }
 0x112   : > { %p500_p2 = pneg %p499_p1 }
 0x114   : > { %637 = dma.done.wait (%p500_p2), %s378_s24, 256  }
 0x115   : > { %639 = vsyncadd (%p500_p2), %s378_s24, 4294967040  ;;  %s20_s20 = sadd.s32 1, %s662_s20   ;;  %s853_s15 = smov %s646_s16 }
 0x116   : > { %p17_p3 = scmp.ge.s32.totalorder %s20_s20, 4   ;;  %s854_s16 = smov %s650_s17 }
 0x117   : > { %s855_s17 = smov %s748_s29  ;;  %s856_s18 = smov %s658_s19 }
 0x118   : > { %s857_s19 = smov %s859_s23  ;;  %19 = sbr.rel (!%p17_p3) target bundleno = 6 (0x6), region = 84 }
 0x11d   :  { %383 = vsyncpa [#allocation3], 1 }
 0x11e   :  { %385 = vsyncpa [#allocation3 + $0x1], 1 }
 0x11f   :  { %386 = vsyncpa [#allocation4], 1 }
 0x120   :  { %388 = vsyncpa [#allocation4 + $0x1], 1 }

</bundles_post_ra>
